<compile_context>
chip_gen: v5e
topology: v5e:2x2
jax: 0.10.0
libtpu: 0.0.40
codegen_flags: <defaults>
</compile_context>

<pallas_src>
import jax
import jax.numpy as jnp
from jax.experimental import pallas as pl
from jax.experimental.pallas import tpu as pltpu


def _round_up(x, m):
    return ((x + m - 1) // m) * m


def siamese_kernel(x1_ref, x2_ref, w1_ref, b1_ref, w2_ref, b2_ref, o1_ref, o2_ref):
    """Fused shared-weight MLP on one [TM, in] tile of each branch.

    x*_ref : [TM, in_features]
    w1_ref : [in_features, hidden]   b1_ref : [1, hidden]
    w2_ref : [hidden, emb]           b2_ref : [1, emb]
    o*_ref : [TM, emb]
    Weights are VMEM-resident across the batch grid; each layer is one MXU dot
    per branch, bias add + ReLU stay on the VPU.
    """
    w1 = w1_ref[...]
    b1 = b1_ref[...]
    w2 = w2_ref[...]
    b2 = b2_ref[...]

    h1 = jnp.maximum(
        jnp.dot(x1_ref[...], w1, preferred_element_type=jnp.float32) + b1, 0.0)
    o1_ref[...] = (jnp.dot(h1, w2, preferred_element_type=jnp.float32)
                   + b2).astype(o1_ref.dtype)

    h2 = jnp.maximum(
        jnp.dot(x2_ref[...], w1, preferred_element_type=jnp.float32) + b1, 0.0)
    o2_ref[...] = (jnp.dot(h2, w2, preferred_element_type=jnp.float32)
                   + b2).astype(o2_ref.dtype)


def _choose_tile(batch, tile_rows):
    """Batch-tile rows: full-extent for tiny/awkward batches, else a multiple of 8
    capped so the grid has >= 2 steps (v7x megacore) and VMEM stays small."""
    if batch <= 8:
        return batch                      # single full block; fixed cost dominates anyway
    if batch % 8 != 0 and batch <= tile_rows:
        return batch                      # full-extent block avoids an uneven tail tile
    half = _round_up(pl.cdiv(batch, 2), 8)
    return min(tile_rows, half)


def siamese_forward(x1, x2, w1, b1, w2, b2, *, tile_rows=8192):
    """Siamese forward: both branches share weights; returns (emb(x1), emb(x2))."""
    assert x1.shape == x2.shape, "both branches must have the same shape"
    B, in_features = x1.shape
    hidden = w1.shape[1]
    emb = w2.shape[1]
    dtype = x1.dtype

    b1 = jnp.reshape(b1, (1, hidden))
    b2 = jnp.reshape(b2, (1, emb))

    tm = _choose_tile(B, tile_rows)
    grid = (pl.cdiv(B, tm),)

    flops = 2 * (2 * B) * (in_features * hidden + hidden * emb)
    itemsize = jnp.dtype(dtype).itemsize
    bytes_accessed = itemsize * (
        2 * B * in_features                 # x1 + x2 reads
        + in_features * hidden + hidden     # layer-1 weight + bias
        + hidden * emb + emb                # layer-2 weight + bias
        + 2 * B * emb                       # o1 + o2 writes
    )

    x_spec = pl.BlockSpec((tm, in_features), lambda i: (i, 0))   # pipelined batch tiles
    o_spec = pl.BlockSpec((tm, emb), lambda i: (i, 0))           # narrow outputs

    o1, o2 = pl.pallas_call(
        siamese_kernel,
        out_shape=(jax.ShapeDtypeStruct((B, emb), dtype),
                   jax.ShapeDtypeStruct((B, emb), dtype)),
        grid=grid,
        in_specs=[
            x_spec,                                              # x1 tile
            x_spec,                                              # x2 tile
            pl.BlockSpec((in_features, hidden), lambda i: (0, 0)),  # w1 (resident)
            pl.BlockSpec((1, hidden), lambda i: (0, 0)),            # b1
            pl.BlockSpec((hidden, emb), lambda i: (0, 0)),          # w2
            pl.BlockSpec((1, emb), lambda i: (0, 0)),               # b2
        ],
        out_specs=(o_spec, o_spec),
        compiler_params=pltpu.CompilerParams(
            dimension_semantics=("parallel",)),
        cost_estimate=pl.CostEstimate(
            flops=flops, transcendentals=0, bytes_accessed=bytes_accessed),
    )(x1, x2, w1, b1, w2, b2)

    return o1, o2


def init_params(key, input_size=24, hidden=64, embedding_size=10, dtype=jnp.float32):
    """Init matching PyTorch nn.Linear default (uniform +/- 1/sqrt(fan_in))."""
    k1, k2, k3, k4 = jax.random.split(key, 4)
    lim1 = 1.0 / jnp.sqrt(jnp.array(input_size, dtype))
    lim2 = 1.0 / jnp.sqrt(jnp.array(hidden, dtype))
    w1 = jax.random.uniform(k1, (input_size, hidden), dtype, -lim1, lim1)
    b1 = jax.random.uniform(k2, (1, hidden), dtype, -lim1, lim1)
    w2 = jax.random.uniform(k3, (hidden, embedding_size), dtype, -lim2, lim2)
    b2 = jax.random.uniform(k4, (1, embedding_size), dtype, -lim2, lim2)
    return w1, b1, w2, b2


def reference_forward(x1, x2, w1, b1, w2, b2):
    def mlp(x):
        h = jnp.maximum(x @ w1 + b1, 0.0)
        return h @ w2 + b2
    return mlp(x1), mlp(x2)


if __name__ == "__main__":
    key = jax.random.PRNGKey(0)
    kx1, kx2, kp = jax.random.split(key, 3)

    B, input_size, embedding_size = 8, 24, 10
    x1 = jax.random.normal(kx1, (B, input_size), jnp.float32)
    x2 = jax.random.normal(kx2, (B, input_size), jnp.float32)

    w1, b1, w2, b2 = init_params(kp, input_size=input_size,
                                 hidden=64, embedding_size=embedding_size)

    o1, o2 = siamese_forward(x1, x2, w1, b1, w2, b2)
    jax.block_until_ready((o1, o2))

    r1, r2 = reference_forward(x1, x2, w1, b1, w2, b2)
    assert o1.shape == (B, embedding_size) and o2.shape == (B, embedding_size)
    assert jnp.allclose(o1, r1, atol=1e-5, rtol=1e-5)
    assert jnp.allclose(o2, r2, atol=1e-5, rtol=1e-5)

    print("KERNEL_OK")
</pallas_src>

<mosaic_0001>
module attributes {stable_mosaic.version = 11 : i64} {
  func.func @siamese_kernel(%arg0: i32, %arg1: memref<8x24xf32, #tpu.memory_space<vmem>>, %arg2: memref<8x24xf32, #tpu.memory_space<vmem>>, %arg3: memref<24x64xf32, #tpu.memory_space<vmem>>, %arg4: memref<1x64xf32, #tpu.memory_space<vmem>>, %arg5: memref<64x10xf32, #tpu.memory_space<vmem>>, %arg6: memref<1x10xf32, #tpu.memory_space<vmem>>, %arg7: memref<8x10xf32, #tpu.memory_space<vmem>>, %arg8: memref<8x10xf32, #tpu.memory_space<vmem>>) attributes {dimension_semantics = [#tpu.dimension_semantics<parallel>], iteration_bounds = array<i64: 1>, scalar_prefetch = 0 : i64, scratch_operands = 0 : i64, tpu.core_type = #tpu.core_type<tc>, window_params = [{transform_indices = @transform_0, window_bounds = array<i64: 8, 24>}, {transform_indices = @transform_1, window_bounds = array<i64: 8, 24>}, {pipeline_mode = #tpu.pipeline_mode<synchronous>, transform_indices = @transform_2, window_bounds = array<i64: 24, 64>}, {pipeline_mode = #tpu.pipeline_mode<synchronous>, transform_indices = @transform_3, window_bounds = array<i64: 1, 64>}, {pipeline_mode = #tpu.pipeline_mode<synchronous>, transform_indices = @transform_4, window_bounds = array<i64: 64, 10>}, {pipeline_mode = #tpu.pipeline_mode<synchronous>, transform_indices = @transform_5, window_bounds = array<i64: 1, 10>}, {transform_indices = @transform_6, window_bounds = array<i64: 8, 10>}, {transform_indices = @transform_7, window_bounds = array<i64: 8, 10>}]} {
    %c0 = arith.constant 0 : index
    %c0_0 = arith.constant 0 : index
    %0 = vector.load %arg3[%c0, %c0_0] : memref<24x64xf32, #tpu.memory_space<vmem>>, vector<24x64xf32>
    %c0_1 = arith.constant 0 : index
    %c0_2 = arith.constant 0 : index
    %1 = vector.load %arg4[%c0_1, %c0_2] : memref<1x64xf32, #tpu.memory_space<vmem>>, vector<1x64xf32>
    %c0_3 = arith.constant 0 : index
    %c0_4 = arith.constant 0 : index
    %2 = vector.load %arg5[%c0_3, %c0_4] : memref<64x10xf32, #tpu.memory_space<vmem>>, vector<64x10xf32>
    %c0_5 = arith.constant 0 : index
    %c0_6 = arith.constant 0 : index
    %3 = vector.load %arg6[%c0_5, %c0_6] : memref<1x10xf32, #tpu.memory_space<vmem>>, vector<1x10xf32>
    %c0_7 = arith.constant 0 : index
    %c0_8 = arith.constant 0 : index
    %4 = vector.load %arg1[%c0_7, %c0_8] : memref<8x24xf32, #tpu.memory_space<vmem>>, vector<8x24xf32>
    %cst = arith.constant dense<0.000000e+00> : vector<8x64xf32>
    %5 = tpu.matmul %4, %0, %cst {dimension_numbers = #tpu.dot_dimension_numbers<[1], [0], [0], [1], [0, 0, 1, 1], [], []>} : vector<8x24xf32>, vector<24x64xf32>, vector<8x64xf32> -> vector<8x64xf32>
    %6 = vector.broadcast %1 : vector<1x64xf32> to vector<8x64xf32>
    %7 = arith.addf %5, %6 : vector<8x64xf32>
    %cst_9 = arith.constant 0.000000e+00 : f32
    %8 = vector.broadcast %cst_9 : f32 to vector<8x64xf32>
    %9 = arith.maximumf %7, %8 : vector<8x64xf32>
    %cst_10 = arith.constant dense<0.000000e+00> : vector<8x10xf32>
    %10 = tpu.matmul %9, %2, %cst_10 {dimension_numbers = #tpu.dot_dimension_numbers<[1], [0], [0], [1], [0, 0, 1, 1], [], []>} : vector<8x64xf32>, vector<64x10xf32>, vector<8x10xf32> -> vector<8x10xf32>
    %11 = vector.broadcast %3 : vector<1x10xf32> to vector<8x10xf32>
    %12 = arith.addf %10, %11 : vector<8x10xf32>
    %c0_11 = arith.constant 0 : index
    %c0_12 = arith.constant 0 : index
    %13 = vector.load %arg7[%c0_11, %c0_12] : memref<8x10xf32, #tpu.memory_space<vmem>>, vector<8x10xf32>
    tpu.vector_store %arg7[%c0_11, %c0_12], %12 {strides = array<i32>} : memref<8x10xf32, #tpu.memory_space<vmem>>, vector<8x10xf32>,
    %c0_13 = arith.constant 0 : index
    %c0_14 = arith.constant 0 : index
    %14 = vector.load %arg2[%c0_13, %c0_14] : memref<8x24xf32, #tpu.memory_space<vmem>>, vector<8x24xf32>
    %cst_15 = arith.constant dense<0.000000e+00> : vector<8x64xf32>
    %15 = tpu.matmul %14, %0, %cst_15 {dimension_numbers = #tpu.dot_dimension_numbers<[1], [0], [0], [1], [0, 0, 1, 1], [], []>} : vector<8x24xf32>, vector<24x64xf32>, vector<8x64xf32> -> vector<8x64xf32>
    %16 = vector.broadcast %1 : vector<1x64xf32> to vector<8x64xf32>
    %17 = arith.addf %15, %16 : vector<8x64xf32>
    %cst_16 = arith.constant 0.000000e+00 : f32
    %18 = vector.broadcast %cst_16 : f32 to vector<8x64xf32>
    %19 = arith.maximumf %17, %18 : vector<8x64xf32>
    %cst_17 = arith.constant dense<0.000000e+00> : vector<8x10xf32>
    %20 = tpu.matmul %19, %2, %cst_17 {dimension_numbers = #tpu.dot_dimension_numbers<[1], [0], [0], [1], [0, 0, 1, 1], [], []>} : vector<8x64xf32>, vector<64x10xf32>, vector<8x10xf32> -> vector<8x10xf32>
    %21 = vector.broadcast %3 : vector<1x10xf32> to vector<8x10xf32>
    %22 = arith.addf %20, %21 : vector<8x10xf32>
    %c0_18 = arith.constant 0 : index
    %c0_19 = arith.constant 0 : index
    %23 = vector.load %arg8[%c0_18, %c0_19] : memref<8x10xf32, #tpu.memory_space<vmem>>, vector<8x10xf32>
    tpu.vector_store %arg8[%c0_18, %c0_19], %22 {strides = array<i32>} : memref<8x10xf32, #tpu.memory_space<vmem>>, vector<8x10xf32>,
    return
  }
  func.func @transform_0(%arg0: i32) -> (i32, i32) {
    %c0_i32 = arith.constant 0 : i32
    %c0_i32_0 = arith.constant 0 : i32
    return %arg0, %c0_i32 : i32, i32
  }
  func.func @transform_1(%arg0: i32) -> (i32, i32) {
    %c0_i32 = arith.constant 0 : i32
    %c0_i32_0 = arith.constant 0 : i32
    return %arg0, %c0_i32 : i32, i32
  }
  func.func @transform_2(%arg0: i32) -> (i32, i32) {
    %c0_i32 = arith.constant 0 : i32
    %c0_i32_0 = arith.constant 0 : i32
    %c0_i32_1 = arith.constant 0 : i32
    return %c0_i32, %c0_i32_0 : i32, i32
  }
  func.func @transform_3(%arg0: i32) -> (i32, i32) {
    %c0_i32 = arith.constant 0 : i32
    %c0_i32_0 = arith.constant 0 : i32
    %c0_i32_1 = arith.constant 0 : i32
    return %c0_i32, %c0_i32_0 : i32, i32
  }
  func.func @transform_4(%arg0: i32) -> (i32, i32) {
    %c0_i32 = arith.constant 0 : i32
    %c0_i32_0 = arith.constant 0 : i32
    %c0_i32_1 = arith.constant 0 : i32
    return %c0_i32, %c0_i32_0 : i32, i32
  }
  func.func @transform_5(%arg0: i32) -> (i32, i32) {
    %c0_i32 = arith.constant 0 : i32
    %c0_i32_0 = arith.constant 0 : i32
    %c0_i32_1 = arith.constant 0 : i32
    return %c0_i32, %c0_i32_0 : i32, i32
  }
  func.func @transform_6(%arg0: i32) -> (i32, i32) {
    %c0_i32 = arith.constant 0 : i32
    %c0_i32_0 = arith.constant 0 : i32
    return %arg0, %c0_i32 : i32, i32
  }
  func.func @transform_7(%arg0: i32) -> (i32, i32) {
    %c0_i32 = arith.constant 0 : i32
    %c0_i32_0 = arith.constant 0 : i32
    return %arg0, %c0_i32 : i32, i32
  }
}

</mosaic_0001>

<bundles_post_ra>
// kernel: tpu_custom_call.1
= control target key start
LH: loop header
LB: loop body
LE: loop exit
PB: predicated region body
PF: predicated region fallthrough
CT: control target
= control target key end

     0   :  { %13 = vsyncpa [#allocation3], 0  ;;  %vm44_vm0 = vcmask 195584   ;;  %s332_s0 = inlined_call_operand.vmem [shape: f32[8,24], index: 0, kind: input, shape index: {}]   ;;  %s333_s1 = inlined_call_operand.vmem [shape: f32[8,24], index: 1, kind: input, shape index: {}]   ;;  %s334_s2 = inlined_call_operand.vmem [shape: f32[24,64], index: 2, kind: input, shape index: {}]   ;;  %s335_s3 = inlined_call_operand.vmem [shape: f32[1,64], index: 3, kind: input, shape index: {}]   ;;  %s336_s4 = inlined_call_operand.vmem [shape: f32[64,10], index: 4, kind: input, shape index: {}]   ;;  %s337_s5 = inlined_call_operand.vmem [shape: f32[1,10], index: 5, kind: input, shape index: {}]   ;;  %s338_s6 = inlined_call_operand.hbm [shape: f32[8,10], index: 6, kind: output, shape index: {0}]   ;;  %s339_s7 = inlined_call_operand.hbm [shape: f32[8,10], index: 7, kind: output, shape index: {1}]  }
   0x1   :  { %v29_v0 = vld [vmem:[%s334_s2 + $0x10] sm:$0xff]  ;;  %v28_v1 = vld [vmem:[%s334_s2 + $0x8] sm:$0xff]  ;;  %v38_v2 = vld [vmem:[%s336_s4 + $0x38] sm:$0xff] }
   0x2   :  { %115 = vmatpush.msra.mxu2 %v29_v0  ;;  %61 = vmatpush.msra.mxu0 %v29_v0  ;;  %v27_v3 = vld [vmem:[%s334_s2] sm:$0xff]  ;;  %v37_v4 = vld [vmem:[%s336_s4 + $0x30] sm:$0xff]  ;;  %v36_v7 = vld [vmem:[%s336_s4 + $0x28] sm:$0xff] }
   0x3   :  { %134 = vmatpush.msra.mxu3 %v38_v2  ;;  %84 = vmatpush.msra.mxu1 %v38_v2  ;;  %v98_v5 = vld [vmem:[%s333_s1] sm:$0xff] }
   0x4   :  { %116 = vmatpush.msra.mxu2 %v28_v1  ;;  %62 = vmatpush.msra.mxu0 %v28_v1  ;;  %v40_v6 = vld [vmem:[%s332_s0] sm:$0xff] }
   0x5   :  { %135 = vmatpush.msra.mxu3 %v37_v4  ;;  %85 = vmatpush.msra.mxu1 %v37_v4 }
   0x6   :  { %14 = vsyncpa [#allocation5], 0  ;;  %117 = vmatpush.msra.mxu2 %v27_v3  ;;  %63 = vmatpush.msra.mxu0 %v27_v3  ;;  %v35_v8 = vld [vmem:[%s336_s4 + $0x20] sm:$0xff]  ;;  %v34_v9 = vld [vmem:[%s336_s4 + $0x18] sm:$0xff]  ;;  %vm72_vm1 = vcmask 523264   ;;  %s154_s8 = sshll.u32 %s338_s6, 4  ;;  %s155_s8 = int_to_ptr.hbm [resolvable:$true] %s154_s8 }
   0x7   :  { %181 = vmatmul.msk.f32.vlgmr.msra.gmra.mxu2 %vm44_vm0, %v98_v5  ;;  %179 = vmatmul.msk.f32.vlgmr.msra.gmra.mxu0 %vm44_vm0, %v40_v6  ;;  %v33_v10 = vld [vmem:[%s336_s4 + $0x10] sm:$0xff]  ;;  %v32_v11 = vld [vmem:[%s336_s4 + $0x8] sm:$0xff]  ;;  %v31_v12 = vld [vmem:[%s336_s4] sm:$0xff]  ;;  %s239_s4 = smov [#allocation2]   ;;  %vm96_vm2 = vcmask 80896   ;;  %s165_s12 = sshll.u32 %s339_s7, 4  ;;  %s166_s12 = int_to_ptr.hbm [resolvable:$true] %s165_s12 }
   0x8   :  { %136 = vmatpush.msra.mxu3 %v36_v7  ;;  %86 = vmatpush.msra.mxu1 %v36_v7  ;;  %v185_v13 = vld [vmem:[%s335_s3] ss:$0 sm:$0xff]  ;;  %s152_s28 = sshll.u32 %s239_s4, 4  ;;  %s240_s3 = smov [#allocation4]   ;;  %s153_s28 = int_to_ptr.vmem [resolvable:$true] %s152_s28 }
   0x9   :  { %v186_v20 = vld [vmem:[%s337_s5] ss:$0 sm:$0xff]  ;;  %s163_s9 = sshll.u32 %s240_s3, 4  ;;  %s164_s9 = int_to_ptr.vmem [resolvable:$true] %s163_s9 }
   0xa   :  { %137 = vmatpush.msra.mxu3 %v35_v8  ;;  %87 = vmatpush.msra.mxu1 %v35_v8 }
   0xc   :  { %138 = vmatpush.msra.mxu3 %v34_v9  ;;  %88 = vmatpush.msra.mxu1 %v34_v9 }
   0xe   :  { %139 = vmatpush.msra.mxu3 %v33_v10  ;;  %89 = vmatpush.msra.mxu1 %v33_v10 }
  0x10   :  { %140 = vmatpush.msra.mxu3 %v32_v11  ;;  %90 = vmatpush.msra.mxu1 %v32_v11 }
  0x12   :  { %141 = vmatpush.msra.mxu3 %v31_v12  ;;  %91 = vmatpush.msra.mxu1 %v31_v12 }
  0x84   :  { %v65_v14 = vpop.f32.mrf.mxu0 }
  0x85   :  { %v66_v15 = vadd.f32 %v185_v13, %v65_v14 }
  0x87   :  { %v68_v16 = vmax.f32 %v66_v15, 0.0 }
  0x89   :  { %180 = vmatmul.msk.f32.vlgmr.msra.gmra.mxu1 %vm72_vm1, %v68_v16 }
  0x8a   :  { %v119_v17 = vpop.f32.mrf.mxu2 }
  0x8b   :  { %v120_v18 = vadd.f32 %v185_v13, %v119_v17 }
  0x8d   :  { %v122_v19 = vmax.f32 %v120_v18, 0.0 }
  0x8f   :  { %182 = vmatmul.msk.f32.vlgmr.msra.gmra.mxu3 %vm72_vm1, %v122_v19 }
 0x106   :  { %v93_v21 = vpop.f32.mrf.mxu1 }
 0x107   :  { %v94_v22 = vadd.f32 %v186_v20, %v93_v21 }
 0x109   :  { %97 = vst.msk [vmem:[#allocation2] sm:$0xff] %vm96_vm2, %v94_v22 }
 0x10a   :  { %157 = dma.vmem_to_hbm [thread:$0]  %s153_s28, 128, %s155_s8, [#allocation3]  }
 0x112   :  { %v143_v23 = vpop.f32.mrf.mxu3 }
 0x113   :  { %v144_v24 = vadd.f32 %v186_v20, %v143_v23 }
 0x115   :  { %146 = vst.msk [vmem:[#allocation4] sm:$0xff] %vm96_vm2, %v144_v24 }
 0x116   :  { %168 = dma.vmem_to_hbm [thread:$0]  %s164_s9, 128, %s166_s12, [#allocation5]  }
 0x117   :  { %235 = dma.done.wait [#allocation3], 128  }
 0x118   :  { %236 = vsyncadd [#allocation3], 4294967168 }
 0x119   :  { %237 = dma.done.wait [#allocation5], 128  }
 0x11a   :  { %238 = vsyncadd [#allocation5], 4294967168 }
 0x11b   :  { %177 = vsyncpa [#allocation3], 1 }
 0x11c   :  { %178 = vsyncpa [#allocation5], 1 }

</bundles_post_ra>
